<compile_context>
chip_gen: v7x
topology: tpu7x:2x2x1
jax: 0.10.0
libtpu: 0.0.40
codegen_flags: <defaults>
</compile_context>

<pallas_src>
import functools
import inspect

import jax
import jax.numpy as jnp
import numpy as np
from jax.experimental import pallas as pl
from jax.experimental.pallas import tpu as pltpu

EPS = 1e-3  # matches nn.BatchNorm2d(out_channels, eps=0.001)


def _round_up(x, m):
    return (x + m - 1) // m * m


_HAS_COST_ESTIMATE = (
    hasattr(pl, "CostEstimate")
    and "cost_estimate" in inspect.signature(pl.pallas_call).parameters
)


def _maybe_cost(flops, bytes_accessed):
    """CostEstimate kwarg if this JAX version supports it (item 9), else {}."""
    if _HAS_COST_ESTIMATE:
        return dict(cost_estimate=pl.CostEstimate(
            flops=int(flops), transcendentals=0, bytes_accessed=int(bytes_accessed)))
    return {}


def _conv_stats_kernel(w_ref, x_ref, mask_ref, z_ref, sum_ref, m2_ref, *,
                       kh, kw, in_w, n_valid):
    """Grid = (batch,). One image per step; implicit im2col on the MXU.

    w_ref    : (KH*KW, Cout, Cin) bf16  per-tap weight matrices (resident block)
    x_ref    : (Cin, P_pad)       bf16  flattened, zero-padded image
    mask_ref : (1, Pc)            f32   1.0 on valid conv-output columns
    z_ref    : (Cout, Pc)         f32   raw conv output (lane-dense)
    sum_ref  : (Cout, 1)          f32   per-image sum over valid columns
    m2_ref   : (Cout, 1)          f32   per-image centered sum of squares
    """
    x = x_ref[...]                                   # (Cin, P_pad)
    pc = z_ref.shape[-1]

    # Implicit im2col: y[:, p] = sum_{i,j} W_ij @ x[:, p + i*W + j].
    # Flat-spatial lane shifts are static slices of the VMEM-resident slab;
    # padded / row-wrap columns produce garbage that is masked out of the
    # statistics and sliced away in the wrapper.
    z = jnp.zeros(z_ref.shape, jnp.float32)
    for i in range(kh):
        for j in range(kw):
            d = i * in_w + j
            xs = x[:, d:d + pc]                      # (Cin, Pc) lane-shifted slab
            z = z + jnp.dot(w_ref[i * kw + j], xs,
                            preferred_element_type=jnp.float32)
    z_ref[...] = z                                   # single conv pass; reused by kernel B

    # Per-image exact two-pass statistics (stable; combined via Chan in wrapper).
    # Conv bias is intentionally dropped: it cancels exactly under training-mode
    # BN, and the mask makes the statistics independent of padded columns anyway.
    mask = mask_ref[...]                             # (1, Pc)
    zm = z * mask
    s = jnp.sum(zm, axis=1, keepdims=True)           # (Cout, 1)
    sum_ref[...] = s
    mean_img = s * (1.0 / n_valid)
    diff = (z - mean_img) * mask
    m2_ref[...] = jnp.sum(diff * diff, axis=1, keepdims=True)


def _bn_relu_kernel(scale_ref, shift_ref, z_ref, o_ref):
    """Grid = (batch, s_tile), fully parallel. Fused BN affine + ReLU."""
    o_ref[...] = jnp.maximum(z_ref[...] * scale_ref[...] + shift_ref[...], 0.0)


@functools.partial(jax.jit, static_argnames=("kh", "kw"))
def batchnorm_conv2d(x, weight, bias, gamma, beta, *, kh, kw):
    """x: NCHW f32; weight: (Cout, Cin, KH, KW); bias/gamma/beta: (Cout,).

    `bias` is accepted to mirror the PyTorch module but is an exact no-op under
    training-mode BatchNorm (it shifts y and its batch mean identically).
    """
    del bias  # cancels exactly under training-mode BN
    n, cin, h, w = x.shape
    cout = weight.shape[0]
    oh, ow = h - kh + 1, w - kw + 1
    n_valid = oh * ow                 # valid conv outputs per image
    m_total = n * n_valid             # BN statistics population

    p = h * w
    d_max = (kh - 1) * w + (kw - 1)                 # largest flat-spatial shift
    pc = _round_up(oh * w, 128)                     # lane-dense conv columns computed
    p_pad = _round_up(pc + d_max, 128)              # flat image length incl. shift halo

    # One cheap pass over x: flatten spatial, pad, cast to bf16 (MXU operand).
    x_flat = x.reshape(n, cin, p)
    x_flat = jnp.pad(x_flat, ((0, 0), (0, 0), (0, p_pad - p))).astype(jnp.bfloat16)

    # Per-tap weight matrices (KH*KW, Cout, Cin), bf16.
    w_taps = jnp.transpose(weight, (2, 3, 0, 1)).reshape(kh * kw, cout, cin)
    w_taps = w_taps.astype(jnp.bfloat16)

    # Valid-column mask over the Pc computed columns: column q = oh_i*W + ow_i is
    # a real conv output iff q < OH*W and (q mod W) < OW.
    col = jnp.arange(pc, dtype=jnp.int32)
    mask = ((col < oh * w) & ((col % w) < ow)).astype(jnp.float32).reshape(1, pc)

    # VMEM budget (item 2/3): 2x-buffered streamed blocks + resident weights,
    # never below the 32 MiB default so the tiny config is unaffected.
    need = (2 * (cin * p_pad * 2 + pc * 4 + cout * pc * 4 + 2 * cout * 4)
            + 2 * kh * kw * cout * cin * 2)
    vmem_limit = int(min(max(32 * 1024 * 1024, 2 * need), 128 * 1024 * 1024))

    # ---- Kernel A: conv + per-image partial statistics (one pass over x) ----
    conv_kernel = functools.partial(
        _conv_stats_kernel, kh=kh, kw=kw, in_w=w, n_valid=float(n_valid))
    flops_a = 2 * n * kh * kw * cout * cin * pc
    bytes_a = (x_flat.size * 2 + w_taps.size * 2 + mask.size * 4
               + n * cout * pc * 4 + 2 * n * cout * 4)

    # TODO(synk): for images too large to hold (Cin, P_pad) + (Cout, Pc) per grid
    # step in VMEM (v7x: 64 MiB/TC), add an output-row tiling axis with manual
    # halo DMA (make_async_copy / pl.ds) instead of the per-image resident slab.
    # TODO(synk): mark the constant-index weight block pl.Buffered(1) and tile
    # Cout/Cin toward MXU-native 128/256 once channel counts are non-toy.
    z, s_img, m2_img = pl.pallas_call(
        conv_kernel,
        out_shape=(
            jax.ShapeDtypeStruct((n, cout, pc), jnp.float32),
            jax.ShapeDtypeStruct((n, cout, 1), jnp.float32),
            jax.ShapeDtypeStruct((n, cout, 1), jnp.float32),
        ),
        grid=(n,),
        in_specs=[
            pl.BlockSpec((kh * kw, cout, cin), lambda b: (0, 0, 0)),  # weights: resident
            pl.BlockSpec((None, cin, p_pad), lambda b: (b, 0, 0)),    # image slab
            pl.BlockSpec((1, pc), lambda b: (0, 0)),                  # valid mask
        ],
        out_specs=(
            pl.BlockSpec((None, cout, pc), lambda b: (b, 0, 0)),      # z (lane-dense)
            pl.BlockSpec((None, cout, 1), lambda b: (b, 0, 0)),       # per-image sum
            pl.BlockSpec((None, cout, 1), lambda b: (b, 0, 0)),       # per-image M2
        ),
        compiler_params=pltpu.CompilerParams(
            dimension_semantics=("parallel",),
            vmem_limit_bytes=vmem_limit),
        **_maybe_cost(flops_a, bytes_a),
    )(w_taps, x_flat, mask)

    # ---- Tiny per-channel math in plain JAX: Chan-combine moments, BN affine ----
    s_img = s_img[:, :, 0]                                   # (N, Cout)
    m2_img = m2_img[:, :, 0]                                 # (N, Cout)
    cnt = jnp.float32(n_valid)
    mean_img = s_img / cnt
    mean = jnp.sum(s_img, axis=0) / m_total                  # (Cout,)
    m2 = jnp.sum(m2_img, axis=0) + cnt * jnp.sum((mean_img - mean[None, :]) ** 2, axis=0)
    var = m2 / m_total                                       # biased var (BN forward)
    scale = (gamma.astype(jnp.float32) * jax.lax.rsqrt(var + EPS)).reshape(cout, 1)
    shift = (beta.astype(jnp.float32) - mean * scale[:, 0]).reshape(cout, 1)

    # ---- Kernel B: fused BN affine + ReLU, fully parallel over (batch, tile) ----
    if pc <= 512:
        ts = pc
    elif pc % 512 == 0:
        ts = 512
    elif pc % 256 == 0:
        ts = 256
    else:
        ts = 128
    flops_b = 3 * n * cout * pc
    bytes_b = 2 * n * cout * pc * 4 + 4 * cout * 4

    out = pl.pallas_call(
        _bn_relu_kernel,
        out_shape=jax.ShapeDtypeStruct((n, cout, pc), jnp.float32),
        grid=(n, pc // ts),
        in_specs=[
            pl.BlockSpec((cout, 1), lambda b, t: (0, 0)),             # scale: resident
            pl.BlockSpec((cout, 1), lambda b, t: (0, 0)),             # shift: resident
            pl.BlockSpec((None, cout, ts), lambda b, t: (b, 0, t)),   # z tile
        ],
        out_specs=pl.BlockSpec((None, cout, ts), lambda b, t: (b, 0, t)),
        compiler_params=pltpu.CompilerParams(
            dimension_semantics=("parallel", "parallel"),             # item 5 (2 TCs on v7x)
            vmem_limit_bytes=vmem_limit),
        **_maybe_cost(flops_b, bytes_b),
    )(scale, shift, z)

    # Lane-dense (N, Cout, Pc) -> NCHW: cheap slice + reshape + slice.
    return out[:, :, :oh * w].reshape(n, cout, oh, w)[:, :, :, :ow]


def _reference(x, weight, bias, gamma, beta):
    """Plain-JAX f32 reference: conv2d(+bias) + training-mode BN + ReLU."""
    y = jax.lax.conv_general_dilated(
        x, weight, window_strides=(1, 1), padding="VALID",
        dimension_numbers=("NCHW", "OIHW", "NCHW"))
    y = y + bias.reshape(1, -1, 1, 1)
    mean = jnp.mean(y, axis=(0, 2, 3), keepdims=True)
    var = jnp.mean((y - mean) ** 2, axis=(0, 2, 3), keepdims=True)
    y_hat = (y - mean) * jax.lax.rsqrt(var + EPS)
    out = y_hat * gamma.reshape(1, -1, 1, 1) + beta.reshape(1, -1, 1, 1)
    return jnp.maximum(out, 0.0)


if __name__ == "__main__":
    # Module config: BatchNormConv2d(in_channels=4, out_channels=8, kernel_size=3)
    N, CIN, H, W = 2, 4, 16, 16
    COUT, KH, KW = 8, 3, 3

    key = jax.random.PRNGKey(0)
    kx, kw_, kb = jax.random.split(key, 3)

    x = jax.random.normal(kx, (N, CIN, H, W), dtype=jnp.float32)

    # PyTorch-style init: Conv2d weight/bias ~ U(-1/sqrt(fan_in), +),
    # BatchNorm2d gamma=1, beta=0 (running stats unused in training-mode forward).
    fan_in = CIN * KH * KW
    bound = 1.0 / float(np.sqrt(fan_in))
    weight = jax.random.uniform(kw_, (COUT, CIN, KH, KW), jnp.float32, -bound, bound)
    bias = jax.random.uniform(kb, (COUT,), jnp.float32, -bound, bound)
    gamma = jnp.ones((COUT,), jnp.float32)
    beta = jnp.zeros((COUT,), jnp.float32)

    out = batchnorm_conv2d(x, weight, bias, gamma, beta, kh=KH, kw=KW)
    out = jax.block_until_ready(out)

    ref = jax.block_until_ready(_reference(x, weight, bias, gamma, beta))
    # bf16 MXU inputs -> compare against the f32 reference at bf16-level tolerance.
    np.testing.assert_allclose(np.asarray(out), np.asarray(ref), rtol=2e-2, atol=2e-2)

    print("KERNEL_OK")
</pallas_src>

<mosaic_0001>
module attributes {stable_mosaic.version = 11 : i64} {
  func.func @_conv_stats_kernel(%arg0: i32, %arg1: memref<9x8x4xbf16, #tpu.memory_space<vmem>>, %arg2: memref<1x4x384xbf16, #tpu.memory_space<vmem>>, %arg3: memref<1x256xf32, #tpu.memory_space<vmem>>, %arg4: memref<1x8x256xf32, #tpu.memory_space<vmem>>, %arg5: memref<1x8x1xf32, #tpu.memory_space<vmem>>, %arg6: memref<1x8x1xf32, #tpu.memory_space<vmem>>) attributes {dimension_semantics = [#tpu.dimension_semantics<parallel>], iteration_bounds = array<i64: 2>, scalar_prefetch = 0 : i64, scratch_operands = 0 : i64, tpu.core_type = #tpu.core_type<tc>, window_params = [{pipeline_mode = #tpu.pipeline_mode<synchronous>, transform_indices = @transform_0, window_bounds = array<i64: 9, 8, 4>}, {transform_indices = @transform_1, window_bounds = array<i64: 1, 4, 384>}, {pipeline_mode = #tpu.pipeline_mode<synchronous>, transform_indices = @transform_2, window_bounds = array<i64: 1, 256>}, {transform_indices = @transform_3, window_bounds = array<i64: 1, 8, 256>}, {transform_indices = @transform_4, window_bounds = array<i64: 1, 8, 1>}, {transform_indices = @transform_5, window_bounds = array<i64: 1, 8, 1>}]} {
    %c0 = arith.constant 0 : index
    %c0_0 = arith.constant 0 : index
    %c0_1 = arith.constant 0 : index
    %0 = vector.load %arg2[%c0, %c0_0, %c0_1] : memref<1x4x384xbf16, #tpu.memory_space<vmem>>, vector<1x4x384xbf16>
    %1 = vector.shape_cast %0 : vector<1x4x384xbf16> to vector<4x384xbf16>
    %cst = arith.constant 0.000000e+00 : f32
    %2 = vector.broadcast %cst : f32 to vector<8x256xf32>
    %3 = vector.extract_strided_slice %1 {offsets = [0, 0], sizes = [4, 256], strides = [1, 1]} : vector<4x384xbf16> to vector<4x256xbf16>
    %c0_2 = arith.constant 0 : index
    %c0_3 = arith.constant 0 : index
    %c0_4 = arith.constant 0 : index
    %4 = vector.load %arg1[%c0_2, %c0_3, %c0_4] : memref<9x8x4xbf16, #tpu.memory_space<vmem>>, vector<1x8x4xbf16>
    %5 = vector.shape_cast %4 : vector<1x8x4xbf16> to vector<8x4xbf16>
    %cst_5 = arith.constant dense<0.000000e+00> : vector<8x256xf32>
    %6 = tpu.matmul %5, %3, %cst_5 {dimension_numbers = #tpu.dot_dimension_numbers<[1], [0], [0], [1], [0, 0, 1, 1], [], []>} : vector<8x4xbf16>, vector<4x256xbf16>, vector<8x256xf32> -> vector<8x256xf32>
    %7 = arith.addf %2, %6 : vector<8x256xf32>
    %8 = vector.extract_strided_slice %1 {offsets = [0, 1], sizes = [4, 256], strides = [1, 1]} : vector<4x384xbf16> to vector<4x256xbf16>
    %c1 = arith.constant 1 : index
    %c0_6 = arith.constant 0 : index
    %c0_7 = arith.constant 0 : index
    %9 = vector.load %arg1[%c1, %c0_6, %c0_7] : memref<9x8x4xbf16, #tpu.memory_space<vmem>>, vector<1x8x4xbf16>
    %10 = vector.shape_cast %9 : vector<1x8x4xbf16> to vector<8x4xbf16>
    %cst_8 = arith.constant dense<0.000000e+00> : vector<8x256xf32>
    %11 = tpu.matmul %10, %8, %cst_8 {dimension_numbers = #tpu.dot_dimension_numbers<[1], [0], [0], [1], [0, 0, 1, 1], [], []>} : vector<8x4xbf16>, vector<4x256xbf16>, vector<8x256xf32> -> vector<8x256xf32>
    %12 = arith.addf %7, %11 : vector<8x256xf32>
    %13 = vector.extract_strided_slice %1 {offsets = [0, 2], sizes = [4, 256], strides = [1, 1]} : vector<4x384xbf16> to vector<4x256xbf16>
    %c2 = arith.constant 2 : index
    %c0_9 = arith.constant 0 : index
    %c0_10 = arith.constant 0 : index
    %14 = vector.load %arg1[%c2, %c0_9, %c0_10] : memref<9x8x4xbf16, #tpu.memory_space<vmem>>, vector<1x8x4xbf16>
    %15 = vector.shape_cast %14 : vector<1x8x4xbf16> to vector<8x4xbf16>
    %cst_11 = arith.constant dense<0.000000e+00> : vector<8x256xf32>
    %16 = tpu.matmul %15, %13, %cst_11 {dimension_numbers = #tpu.dot_dimension_numbers<[1], [0], [0], [1], [0, 0, 1, 1], [], []>} : vector<8x4xbf16>, vector<4x256xbf16>, vector<8x256xf32> -> vector<8x256xf32>
    %17 = arith.addf %12, %16 : vector<8x256xf32>
    %18 = vector.extract_strided_slice %1 {offsets = [0, 16], sizes = [4, 256], strides = [1, 1]} : vector<4x384xbf16> to vector<4x256xbf16>
    %c3 = arith.constant 3 : index
    %c0_12 = arith.constant 0 : index
    %c0_13 = arith.constant 0 : index
    %19 = vector.load %arg1[%c3, %c0_12, %c0_13] : memref<9x8x4xbf16, #tpu.memory_space<vmem>>, vector<1x8x4xbf16>
    %20 = vector.shape_cast %19 : vector<1x8x4xbf16> to vector<8x4xbf16>
    %cst_14 = arith.constant dense<0.000000e+00> : vector<8x256xf32>
    %21 = tpu.matmul %20, %18, %cst_14 {dimension_numbers = #tpu.dot_dimension_numbers<[1], [0], [0], [1], [0, 0, 1, 1], [], []>} : vector<8x4xbf16>, vector<4x256xbf16>, vector<8x256xf32> -> vector<8x256xf32>
    %22 = arith.addf %17, %21 : vector<8x256xf32>
    %23 = vector.extract_strided_slice %1 {offsets = [0, 17], sizes = [4, 256], strides = [1, 1]} : vector<4x384xbf16> to vector<4x256xbf16>
    %c4 = arith.constant 4 : index
    %c0_15 = arith.constant 0 : index
    %c0_16 = arith.constant 0 : index
    %24 = vector.load %arg1[%c4, %c0_15, %c0_16] : memref<9x8x4xbf16, #tpu.memory_space<vmem>>, vector<1x8x4xbf16>
    %25 = vector.shape_cast %24 : vector<1x8x4xbf16> to vector<8x4xbf16>
    %cst_17 = arith.constant dense<0.000000e+00> : vector<8x256xf32>
    %26 = tpu.matmul %25, %23, %cst_17 {dimension_numbers = #tpu.dot_dimension_numbers<[1], [0], [0], [1], [0, 0, 1, 1], [], []>} : vector<8x4xbf16>, vector<4x256xbf16>, vector<8x256xf32> -> vector<8x256xf32>
    %27 = arith.addf %22, %26 : vector<8x256xf32>
    %28 = vector.extract_strided_slice %1 {offsets = [0, 18], sizes = [4, 256], strides = [1, 1]} : vector<4x384xbf16> to vector<4x256xbf16>
    %c5 = arith.constant 5 : index
    %c0_18 = arith.constant 0 : index
    %c0_19 = arith.constant 0 : index
    %29 = vector.load %arg1[%c5, %c0_18, %c0_19] : memref<9x8x4xbf16, #tpu.memory_space<vmem>>, vector<1x8x4xbf16>
    %30 = vector.shape_cast %29 : vector<1x8x4xbf16> to vector<8x4xbf16>
    %cst_20 = arith.constant dense<0.000000e+00> : vector<8x256xf32>
    %31 = tpu.matmul %30, %28, %cst_20 {dimension_numbers = #tpu.dot_dimension_numbers<[1], [0], [0], [1], [0, 0, 1, 1], [], []>} : vector<8x4xbf16>, vector<4x256xbf16>, vector<8x256xf32> -> vector<8x256xf32>
    %32 = arith.addf %27, %31 : vector<8x256xf32>
    %33 = vector.extract_strided_slice %1 {offsets = [0, 32], sizes = [4, 256], strides = [1, 1]} : vector<4x384xbf16> to vector<4x256xbf16>
    %c6 = arith.constant 6 : index
    %c0_21 = arith.constant 0 : index
    %c0_22 = arith.constant 0 : index
    %34 = vector.load %arg1[%c6, %c0_21, %c0_22] : memref<9x8x4xbf16, #tpu.memory_space<vmem>>, vector<1x8x4xbf16>
    %35 = vector.shape_cast %34 : vector<1x8x4xbf16> to vector<8x4xbf16>
    %cst_23 = arith.constant dense<0.000000e+00> : vector<8x256xf32>
    %36 = tpu.matmul %35, %33, %cst_23 {dimension_numbers = #tpu.dot_dimension_numbers<[1], [0], [0], [1], [0, 0, 1, 1], [], []>} : vector<8x4xbf16>, vector<4x256xbf16>, vector<8x256xf32> -> vector<8x256xf32>
    %37 = arith.addf %32, %36 : vector<8x256xf32>
    %38 = vector.extract_strided_slice %1 {offsets = [0, 33], sizes = [4, 256], strides = [1, 1]} : vector<4x384xbf16> to vector<4x256xbf16>
    %c7 = arith.constant 7 : index
    %c0_24 = arith.constant 0 : index
    %c0_25 = arith.constant 0 : index
    %39 = vector.load %arg1[%c7, %c0_24, %c0_25] : memref<9x8x4xbf16, #tpu.memory_space<vmem>>, vector<1x8x4xbf16>
    %40 = vector.shape_cast %39 : vector<1x8x4xbf16> to vector<8x4xbf16>
    %cst_26 = arith.constant dense<0.000000e+00> : vector<8x256xf32>
    %41 = tpu.matmul %40, %38, %cst_26 {dimension_numbers = #tpu.dot_dimension_numbers<[1], [0], [0], [1], [0, 0, 1, 1], [], []>} : vector<8x4xbf16>, vector<4x256xbf16>, vector<8x256xf32> -> vector<8x256xf32>
    %42 = arith.addf %37, %41 : vector<8x256xf32>
    %43 = vector.extract_strided_slice %1 {offsets = [0, 34], sizes = [4, 256], strides = [1, 1]} : vector<4x384xbf16> to vector<4x256xbf16>
    %c8 = arith.constant 8 : index
    %c0_27 = arith.constant 0 : index
    %c0_28 = arith.constant 0 : index
    %44 = vector.load %arg1[%c8, %c0_27, %c0_28] : memref<9x8x4xbf16, #tpu.memory_space<vmem>>, vector<1x8x4xbf16>
    %45 = vector.shape_cast %44 : vector<1x8x4xbf16> to vector<8x4xbf16>
    %cst_29 = arith.constant dense<0.000000e+00> : vector<8x256xf32>
    %46 = tpu.matmul %45, %43, %cst_29 {dimension_numbers = #tpu.dot_dimension_numbers<[1], [0], [0], [1], [0, 0, 1, 1], [], []>} : vector<8x4xbf16>, vector<4x256xbf16>, vector<8x256xf32> -> vector<8x256xf32>
    %47 = arith.addf %42, %46 : vector<8x256xf32>
    %c0_30 = arith.constant 0 : index
    %c0_31 = arith.constant 0 : index
    %c0_32 = arith.constant 0 : index
    %48 = vector.load %arg4[%c0_30, %c0_31, %c0_32] : memref<1x8x256xf32, #tpu.memory_space<vmem>>, vector<1x8x256xf32>
    %49 = vector.shape_cast %48 : vector<1x8x256xf32> to vector<8x256xf32>
    %50 = vector.shape_cast %47 : vector<8x256xf32> to vector<1x8x256xf32>
    tpu.vector_store %arg4[%c0_30, %c0_31, %c0_32], %50 {strides = array<i32>} : memref<1x8x256xf32, #tpu.memory_space<vmem>>, vector<1x8x256xf32>,
    %c0_33 = arith.constant 0 : index
    %c0_34 = arith.constant 0 : index
    %51 = vector.load %arg3[%c0_33, %c0_34] : memref<1x256xf32, #tpu.memory_space<vmem>>, vector<1x256xf32>
    %52 = vector.broadcast %51 : vector<1x256xf32> to vector<8x256xf32>
    %53 = arith.mulf %47, %52 : vector<8x256xf32>
    %cst_35 = arith.constant dense<0.000000e+00> : vector<8xf32>
    %54 = vector.multi_reduction <add>, %53, %cst_35 [1] : vector<8x256xf32> to vector<8xf32>
    %55 = vector.shape_cast %54 : vector<8xf32> to vector<8x1xf32>
    %c0_36 = arith.constant 0 : index
    %c0_37 = arith.constant 0 : index
    %c0_38 = arith.constant 0 : index
    %56 = vector.load %arg5[%c0_36, %c0_37, %c0_38] : memref<1x8x1xf32, #tpu.memory_space<vmem>>, vector<1x8x1xf32>
    %57 = vector.shape_cast %56 : vector<1x8x1xf32> to vector<8x1xf32>
    %58 = vector.shape_cast %55 : vector<8x1xf32> to vector<1x8x1xf32>
    tpu.vector_store %arg5[%c0_36, %c0_37, %c0_38], %58 {strides = array<i32>} : memref<1x8x1xf32, #tpu.memory_space<vmem>>, vector<1x8x1xf32>,
    %cst_39 = arith.constant 0.00510204071 : f32
    %59 = vector.broadcast %cst_39 : f32 to vector<8x1xf32>
    %60 = arith.mulf %55, %59 : vector<8x1xf32>
    %61 = vector.broadcast %60 : vector<8x1xf32> to vector<8x256xf32>
    %62 = arith.subf %47, %61 : vector<8x256xf32>
    %63 = vector.broadcast %51 : vector<1x256xf32> to vector<8x256xf32>
    %64 = arith.mulf %62, %63 : vector<8x256xf32>
    %65 = arith.mulf %64, %64 : vector<8x256xf32>
    %cst_40 = arith.constant dense<0.000000e+00> : vector<8xf32>
    %66 = vector.multi_reduction <add>, %65, %cst_40 [1] : vector<8x256xf32> to vector<8xf32>
    %67 = vector.shape_cast %66 : vector<8xf32> to vector<8x1xf32>
    %c0_41 = arith.constant 0 : index
    %c0_42 = arith.constant 0 : index
    %c0_43 = arith.constant 0 : index
    %68 = vector.load %arg6[%c0_41, %c0_42, %c0_43] : memref<1x8x1xf32, #tpu.memory_space<vmem>>, vector<1x8x1xf32>
    %69 = vector.shape_cast %68 : vector<1x8x1xf32> to vector<8x1xf32>
    %70 = vector.shape_cast %67 : vector<8x1xf32> to vector<1x8x1xf32>
    tpu.vector_store %arg6[%c0_41, %c0_42, %c0_43], %70 {strides = array<i32>} : memref<1x8x1xf32, #tpu.memory_space<vmem>>, vector<1x8x1xf32>,
    return
  }
  func.func @transform_0(%arg0: i32) -> (i32, i32, i32) {
    %c0_i32 = arith.constant 0 : i32
    %c0_i32_0 = arith.constant 0 : i32
    %c0_i32_1 = arith.constant 0 : i32
    %c0_i32_2 = arith.constant 0 : i32
    return %c0_i32, %c0_i32_0, %c0_i32_1 : i32, i32, i32
  }
  func.func @transform_1(%arg0: i32) -> (i32, i32, i32) {
    %c0_i32 = arith.constant 0 : i32
    %c0_i32_0 = arith.constant 0 : i32
    %c0_i32_1 = arith.constant 0 : i32
    return %arg0, %c0_i32, %c0_i32_0 : i32, i32, i32
  }
  func.func @transform_2(%arg0: i32) -> (i32, i32) {
    %c0_i32 = arith.constant 0 : i32
    %c0_i32_0 = arith.constant 0 : i32
    %c0_i32_1 = arith.constant 0 : i32
    return %c0_i32, %c0_i32_0 : i32, i32
  }
  func.func @transform_3(%arg0: i32) -> (i32, i32, i32) {
    %c0_i32 = arith.constant 0 : i32
    %c0_i32_0 = arith.constant 0 : i32
    %c0_i32_1 = arith.constant 0 : i32
    return %arg0, %c0_i32, %c0_i32_0 : i32, i32, i32
  }
  func.func @transform_4(%arg0: i32) -> (i32, i32, i32) {
    %c0_i32 = arith.constant 0 : i32
    %c0_i32_0 = arith.constant 0 : i32
    %c0_i32_1 = arith.constant 0 : i32
    return %arg0, %c0_i32, %c0_i32_0 : i32, i32, i32
  }
  func.func @transform_5(%arg0: i32) -> (i32, i32, i32) {
    %c0_i32 = arith.constant 0 : i32
    %c0_i32_0 = arith.constant 0 : i32
    %c0_i32_1 = arith.constant 0 : i32
    return %arg0, %c0_i32, %c0_i32_0 : i32, i32, i32
  }
}

module attributes {stable_mosaic.version = 11 : i64} {
  func.func @_bn_relu_kernel(%arg0: i32, %arg1: i32, %arg2: memref<8x1xf32, #tpu.memory_space<vmem>>, %arg3: memref<8x1xf32, #tpu.memory_space<vmem>>, %arg4: memref<1x8x256xf32, #tpu.memory_space<vmem>>, %arg5: memref<1x8x256xf32, #tpu.memory_space<vmem>>) attributes {dimension_semantics = [#tpu.dimension_semantics<parallel>, #tpu.dimension_semantics<parallel>], iteration_bounds = array<i64: 2, 1>, scalar_prefetch = 0 : i64, scratch_operands = 0 : i64, tpu.core_type = #tpu.core_type<tc>, window_params = [{pipeline_mode = #tpu.pipeline_mode<synchronous>, transform_indices = @transform_0, window_bounds = array<i64: 8, 1>}, {pipeline_mode = #tpu.pipeline_mode<synchronous>, transform_indices = @transform_1, window_bounds = array<i64: 8, 1>}, {transform_indices = @transform_2, window_bounds = array<i64: 1, 8, 256>}, {transform_indices = @transform_3, window_bounds = array<i64: 1, 8, 256>}]} {
    %c0 = arith.constant 0 : index
    %c0_0 = arith.constant 0 : index
    %c0_1 = arith.constant 0 : index
    %0 = vector.load %arg4[%c0, %c0_0, %c0_1] : memref<1x8x256xf32, #tpu.memory_space<vmem>>, vector<1x8x256xf32>
    %1 = vector.shape_cast %0 : vector<1x8x256xf32> to vector<8x256xf32>
    %c0_2 = arith.constant 0 : index
    %c0_3 = arith.constant 0 : index
    %2 = vector.load %arg2[%c0_2, %c0_3] : memref<8x1xf32, #tpu.memory_space<vmem>>, vector<8x1xf32>
    %3 = vector.broadcast %2 : vector<8x1xf32> to vector<8x256xf32>
    %4 = arith.mulf %1, %3 : vector<8x256xf32>
    %c0_4 = arith.constant 0 : index
    %c0_5 = arith.constant 0 : index
    %5 = vector.load %arg3[%c0_4, %c0_5] : memref<8x1xf32, #tpu.memory_space<vmem>>, vector<8x1xf32>
    %6 = vector.broadcast %5 : vector<8x1xf32> to vector<8x256xf32>
    %7 = arith.addf %4, %6 : vector<8x256xf32>
    %cst = arith.constant 0.000000e+00 : f32
    %8 = vector.broadcast %cst : f32 to vector<8x256xf32>
    %9 = arith.maximumf %7, %8 : vector<8x256xf32>
    %c0_6 = arith.constant 0 : index
    %c0_7 = arith.constant 0 : index
    %c0_8 = arith.constant 0 : index
    %10 = vector.load %arg5[%c0_6, %c0_7, %c0_8] : memref<1x8x256xf32, #tpu.memory_space<vmem>>, vector<1x8x256xf32>
    %11 = vector.shape_cast %10 : vector<1x8x256xf32> to vector<8x256xf32>
    %12 = vector.shape_cast %9 : vector<8x256xf32> to vector<1x8x256xf32>
    tpu.vector_store %arg5[%c0_6, %c0_7, %c0_8], %12 {strides = array<i32>} : memref<1x8x256xf32, #tpu.memory_space<vmem>>, vector<1x8x256xf32>,
    return
  }
  func.func @transform_0(%arg0: i32, %arg1: i32) -> (i32, i32) {
    %c0_i32 = arith.constant 0 : i32
    %c0_i32_0 = arith.constant 0 : i32
    %c0_i32_1 = arith.constant 0 : i32
    return %c0_i32, %c0_i32_0 : i32, i32
  }
  func.func @transform_1(%arg0: i32, %arg1: i32) -> (i32, i32) {
    %c0_i32 = arith.constant 0 : i32
    %c0_i32_0 = arith.constant 0 : i32
    %c0_i32_1 = arith.constant 0 : i32
    return %c0_i32, %c0_i32_0 : i32, i32
  }
  func.func @transform_2(%arg0: i32, %arg1: i32) -> (i32, i32, i32) {
    %c0_i32 = arith.constant 0 : i32
    %c0_i32_0 = arith.constant 0 : i32
    return %arg0, %c0_i32, %arg1 : i32, i32, i32
  }
  func.func @transform_3(%arg0: i32, %arg1: i32) -> (i32, i32, i32) {
    %c0_i32 = arith.constant 0 : i32
    %c0_i32_0 = arith.constant 0 : i32
    return %arg0, %c0_i32, %arg1 : i32, i32, i32
  }
}

</mosaic_0001>

<bundles_post_ra>
// kernel: batchnorm_conv2d.3
= control target key start
LH: loop header
LB: loop body
LE: loop exit
PB: predicated region body
PF: predicated region fallthrough
CT: control target
= control target key end

     0   :  { %s403_s12 = smov 0   ;;  %s405_s13 = smov 0   ;;  %s442_s0 = inlined_call_operand.vmem [shape: f32[8,1], index: 0, kind: input, shape index: {}]   ;;  %s443_s1 = inlined_call_operand.vmem [shape: f32[8,1], index: 1, kind: input, shape index: {}]   ;;  %s444_s2 = inlined_call_operand.vmem [shape: f32[2,8,256], index: 2, kind: input, shape index: {}]   ;;  %s445_s3 = inlined_call_operand.vmem [shape: f32[2,8,256], index: 3, kind: output, shape index: {}]  }
   0x1   :  { %s407_s14 = smov 0  }
   0x2 LB: > { %s25_s15 = sadd.s32 1, %s376_s13  ;;  %p323_p0 = scmp.ge.s32.totalorder %s380_s14, 1  ;;  %s380_s14 = sphi %s407_s14, %s13_s14   ;;  %s376_s13 = sphi %s405_s13, %s447_s13   ;;  %s372_s12 = sphi %s403_s12, %s446_s12  }
   0x3   : > { %p27_p1 = scmp.ge.s32.totalorder %s25_s15, 2  ;;  %p158_p2 = scmp.lt.s32.totalorder %s380_s14, 3 }
   0x5   : > { %s449_s15 = smov (%p27_p1, %s25_s15), 0  ;;  %p159_p3 = pnand %p323_p0, %p158_p2 }
   0x6   : > { %v212_v0 = vld [vmem:[%s442_s0] sm:$0xff] (!%p159_p3)  ;;  %v382_v1 = vmov (!%p159_p3), 0   ;;  %p191_p4 = scmp.lt.s32.totalorder (!%p159_p3), %s372_s12, 1 }
   0x7   : > { %162 = sbr.rel (%p159_p3) target bundleno = 145 (0x91), region = 32  ;;  %357 = vset.pattern.permute.xlu0 (!%p159_p3), %v382_v1  ;;  %v220_v2 = vld [vmem:[%s443_s1] sm:$0xff] (!%p159_p3) }
   0x8   : > { %215 = vperm.xlu0 (!%p159_p3), %357, %v212_v0  }
   0xc   : > { %223 = vperm.xlu0 (!%p159_p3), %357, %v220_v2  }
   0xe   : > { %s451_s12 = smov (!%p191_p4, %s372_s12), 1 }
   0xf   : > { %s330_s20 = sshll.u32 %s451_s12, 4 }
  0x10   : > { %s198_s23 = scalar_lea.vmem %s444_s2, %s330_s20  ;;  %s208_s26 = scalar_lea.vmem %s445_s3, %s330_s20 }
  0x11   : > { %v210_v4 = vld [vmem:[%s198_s23] sm:$0xff]  ;;  %v211_v5 = vld [vmem:[%s198_s23 + $0x8] sm:$0xff] }
  0x87   : > { %v216_v3 = vpop.permute.xlu0 %215 }
  0x88   : > { %v218_v6 = vmul.f32 %v216_v3, %v210_v4  ;;  %v219_v7 = vmul.f32 %v216_v3, %v211_v5 }
  0x8b   : > { %v224_v8 = vpop.permute.xlu0 %223 }
  0x8c   : > { %v226_v9 = vadd.f32 %v224_v8, %v218_v6  ;;  %v227_v10 = vadd.f32 %v224_v8, %v219_v7 }
  0x8e   : > { %v228_v11 = vmax.f32 %v226_v9, 0.0  ;;  %v229_v12 = vmax.f32 %v227_v10, 0.0 }
  0x90   : > { %230 = vst [vmem:[%s208_s26] sm:$0xff] %v228_v11  ;;  %231 = vst [vmem:[%s208_s26 + $0x8] sm:$0xff] %v229_v12 }
  0x91 PF: > { %s13_s14 = sadd.s32 1, %s380_s14   ;;  %s446_s12 = smov %s376_s13 }
  0x92   : > { %p10_p5 = scmp.ge.s32.totalorder %s13_s14, 4   ;;  %s447_s13 = smov %s449_s15 }
  0x94   :  { %12 = sbr.rel (!%p10_p5) target bundleno = 2 (0x2), region = 62 }

// kernel: batchnorm_conv2d.2
= control target key start
LH: loop header
LB: loop body
LE: loop exit
PB: predicated region body
PF: predicated region fallthrough
CT: control target
= control target key end

     0   :  { %s1106_s18 = smov 0   ;;  %s1218_s0 = inlined_call_operand.vmem [shape: bf16[9,8,4], index: 0, kind: input, shape index: {}]   ;;  %s1219_s1 = inlined_call_operand.vmem [shape: bf16[2,4,384], index: 1, kind: input, shape index: {}]   ;;  %s1220_s2 = inlined_call_operand.vmem [shape: f32[1,256], index: 2, kind: input, shape index: {}]   ;;  %s1221_s3 = inlined_call_operand.vmem [shape: f32[2,8,256], index: 3, kind: output, shape index: {0}]   ;;  %s1222_s4 = inlined_call_operand.vmem [shape: f32[2,8,1], index: 4, kind: output, shape index: {1}]   ;;  %s1223_s5 = inlined_call_operand.vmem [shape: f32[2,8,1], index: 5, kind: output, shape index: {2}]  }
   0x1 LB: > { %s969_s19 = sadd.s32 4294967295, %s1064_s18   ;;  %p973_p0 = scmp.ge.s32.totalorder %s1064_s18, 1  ;;  %s1064_s18 = sphi %s1106_s18, %s16_s18  }
   0x2   : > { %p192_p1 = scmp.lt.s32.totalorder %s1064_s18, 3 }
   0x4   : > { %p193_p2 = pnand %p973_p0, %p192_p1 }
   0x5   : > { %p228_p3 = scmp.lt.s32.totalorder (!%p193_p2), %s969_s19, 1  ;;  %v256_v0 = vlaneseq (!%p193_p2)  ;;  %v1066_v1 = vmov (!%p193_p2), 1983009808   ;;  %v1067_v6 = vmov (!%p193_p2), 0   ;;  %s1068_s24 = smov (!%p193_p2), 111   ;;  %vm513_vm0 = vcmask (!%p193_p2), 908288  }
   0x6   : > { %196 = sbr.rel (%p193_p2) target bundleno = 706 (0x2c2), region = 32  ;;  %v254_v2 = vunpack.c.l.s4 (!%p193_p2), %v1066_v1  ;;  %557 = vmatprep.mubr.bf16.mxu0 (!%p193_p2), %v1067_v6  ;;  %320 = vmatprep.mubr.bf16.mxu1 (!%p193_p2), %v1067_v6  ;;  %s1069_s25 = smov (!%p193_p2), 127   ;;  %vm281_vm1 = vcmask (!%p193_p2), 1041408   ;;  %vm277_vm2 = vcmask (!%p193_p2), 31744   ;;  %v990_v19 = vld [vmem:[%s1218_s0 + $0x10] sm:$0xf] (!%p193_p2) }
   0x7   : > { %v1116_v3 = vshrl.u32 (!%p193_p2), %v256_v0, 7  ;;  %s1070_s26 = smov (!%p193_p2), 110   ;;  %s1071_s27 = smov (!%p193_p2), 96   ;;  %vm274_vm3 = vcmask (!%p193_p2), 1039360   ;;  %vm576_vm4 = vcmask (!%p193_p2), 900096   ;;  %vm639_vm5 = vcmask (!%p193_p2), 785408  }
   0x8   : > { %v255_v4 = vunpack.c.0.s8 (!%p193_p2), %v254_v2  ;;  %s1072_s28 = smov (!%p193_p2), 126   ;;  %s1073_s29 = smov (!%p193_p2), 95   ;;  %v979_v28 = vld [vmem:[%s1218_s0 + $0x4] sm:$0xf] (!%p193_p2)  ;;  %v993_v34 = vld [vmem:[%s1218_s0 + $0x14] sm:$0xf] (!%p193_p2) }
   0x9   : > { %s1074_s30 = smov (!%p193_p2), 112   ;;  %s1075_s6 = smov (!%p193_p2), 94   ;;  %vm387_vm6 = vcmask (!%p193_p2), 1031168   ;;  %v248_v43 = vld [vmem:[%s1218_s0] sm:$0xf] (!%p193_p2)  ;;  %vm702_vm7 = vcmask (!%p193_p2), 777216  }
   0xa   : > { %v258_v5 = vsub.s32 (!%p193_p2), %v255_v4, %v1116_v3  ;;  %v996_v48 = vld [vmem:[%s1218_s0 + $0x18] sm:$0xf] (!%p193_p2)  ;;  %vm450_vm8 = vcmask (!%p193_p2), 916480   ;;  %v984_v57 = vld [vmem:[%s1218_s0 + $0x8] sm:$0xf] (!%p193_p2)  ;;  %vm765_vm9 = vcmask (!%p193_p2), 769024  }
   0xb   : > { %v999_v62 = vld [vmem:[%s1218_s0 + $0x1c] sm:$0xf] (!%p193_p2)  ;;  %vm839_vm10 = vcmask (!%p193_p2), 7168  }
   0xd   : > { %s1225_s19 = smov (!%p228_p3, %s969_s19), 1 }
   0xe   : > { %s1038_s20 = smul.u32 6, %s1225_s19  ;;  %s977_s8 = sshll.u32 %s1225_s19, 3 }
   0xf   : > { %s241_s11 = scalar_lea.vmem %s1222_s4, %s977_s8 }
  0x10   : > { %s232_s23 = scalar_lea.vmem %s1219_s1, %s1038_s20 }
  0x11   : > { %v247_v7 = vld [vmem:[%s232_s23] sm:$0x3f] }
  0x12   : > { %v1125_v8 = vrot.slane %v247_v7, %v258_v5  ;;  %v252_v9 = vcombine.high %v247_v7, %v247_v7  ;;  %v1002_v7 = vld [vmem:[%s1218_s0 + $0x20] sm:$0xf] }
  0x14   : > { %507 = vrot.lane.b32.xlu0 %v1125_v8, %s1068_s24  ;;  %v266_v10 = vrot.slane %v252_v9, %v258_v5  ;;  %v267_v11 = vcombine.high %v1125_v8, %v1125_v8  ;;  %v333_v30 = vsel %vm281_vm1, %v1125_v8, 0  ;;  %v987_v5 = vld [vmem:[%s1218_s0 + $0xc] sm:$0xf] }
  0x16   : > { %511 = vrot.lane.b32.xlu1 %v266_v10, %s1068_s24 }
  0x18   : > { %509 = vrot.lane.b32.xlu0 %v267_v11, %s1068_s24 }
  0x1a   : > { %268 = vrot.lane.b32.xlu1 %v1125_v8, %s1069_s25 }
  0x1c   : > { %570 = vrot.lane.b32.xlu0 %v1125_v8, %s1070_s26 }
  0x1e   : > { %272 = vrot.lane.b32.xlu1 %v266_v10, %s1069_s25 }
  0x20   : > { %270 = vrot.lane.b32.xlu0 %v267_v11, %s1069_s25 }
  0x22   : > { %572 = vrot.lane.b32.xlu1 %v267_v11, %s1070_s26 }
  0x24   : > { %574 = vrot.lane.b32.xlu0 %v266_v10, %s1070_s26 }
  0x26   : > { %633 = vrot.lane.b32.xlu1 %v1125_v8, %s1071_s27 }
  0x28   : > { %635 = vrot.lane.b32.xlu0 %v267_v11, %s1071_s27 }
  0x2a   : > { %637 = vrot.lane.b32.xlu1 %v266_v10, %s1071_s27 }
  0x2c   : > { %381 = vrot.lane.b32.xlu0 %v1125_v8, %s1072_s28 }
  0x2e   : > { %383 = vrot.lane.b32.xlu1 %v267_v11, %s1072_s28 }
  0x30   : > { %385 = vrot.lane.b32.xlu0 %v266_v10, %s1072_s28 }
  0x32   : > { %696 = vrot.lane.b32.xlu1 %v1125_v8, %s1073_s29 }
  0x34   : > { %698 = vrot.lane.b32.xlu0 %v267_v11, %s1073_s29 }
  0x36   : > { %700 = vrot.lane.b32.xlu1 %v266_v10, %s1073_s29  ;;  %s1007_s29 = sshll.u32 %s1225_s19, 4  ;;  %s245_s19 = scalar_lea.vmem %s1223_s5, %s977_s8 }
  0x37   : > { %s237_s7 = scalar_lea.vmem %s1221_s3, %s1007_s29 }
  0x38   : > { %444 = vrot.lane.b32.xlu0 %v1125_v8, %s1074_s30 }
  0x3a   : > { %446 = vrot.lane.b32.xlu1 %v267_v11, %s1074_s30 }
  0x3c   : > { %448 = vrot.lane.b32.xlu0 %v266_v10, %s1074_s30 }
  0x3e   : > { %759 = vrot.lane.b32.xlu1 %v1125_v8, %s1075_s6  ;;  %v826_v8 = vsub.s32 0, %v1116_v3 }
  0x40   : > { %761 = vrot.lane.b32.xlu0 %v267_v11, %s1075_s6 }
  0x42   : > { %763 = vrot.lane.b32.xlu1 %v266_v10, %s1075_s6  ;;  %v830_v10 = vsub.s32 1, %v1116_v3 }
  0x86   : > { %v508_v12 = vpop.permute.xlu0 %507 }
  0x88   : > { %v512_v13 = vpop.permute.xlu1 %511 }
  0x8a   : > { %v510_v14 = vpop.permute.xlu0 %509 }
  0x8b   : > { %v515_v15 = vsel %vm513_vm0, %v510_v14, %v512_v13  ;;  %v514_v16 = vsel %vm513_vm0, %v508_v12, %v510_v14 }
  0x8c   : > { %991 = vmatprep.subr.msk.bf16.mxu0 %vm281_vm1, %v515_v15  ;;  %v269_v17 = vpop.permute.xlu1 %268  ;;  %v520_v18 = vsel %vm281_vm1, %v514_v16, 0 }
  0x8d   : > { %526 = vmatpush1.bf16.msra.mxu0 %v520_v18 }
  0x8e   : > { %v571_v20 = vpop.permute.xlu0 %570 }
  0x90   : > { %992 = vmatmul.mubr.msk.bf16.vlgmr.msra.gmra.mrb[0].mxu0 %vm277_vm2, %v990_v19  ;;  %v273_v21 = vpop.permute.xlu1 %272 }
  0x91   : > { %620 = vmatprep.mubr.bf16.mxu0 %v1067_v6 }
  0x92   : > { %v271_v22 = vpop.permute.xlu0 %270 }
  0x93   : > { %v276_v23 = vsel %vm274_vm3, %v271_v22, %v273_v21  ;;  %v275_v24 = vsel %vm274_vm3, %v269_v17, %v271_v22 }
  0x94   : > { %980 = vmatprep.subr.msk.bf16.mxu1 %vm281_vm1, %v276_v23  ;;  %v573_v25 = vpop.permute.xlu1 %572  ;;  %v283_v26 = vsel %vm281_vm1, %v275_v24, 0 }
  0x95   : > { %v577_v27 = vsel %vm576_vm4, %v571_v20, %v573_v25  ;;  %289 = vmatpush1.bf16.msra.mxu1 %v283_v26 }
  0x96   : > { %v575_v29 = vpop.permute.xlu0 %574  ;;  %982 = vmatprep.subr.msk.bf16.mxu1 %vm281_vm1, %v267_v11  ;;  %v583_v32 = vsel %vm281_vm1, %v577_v27, 0 }
  0x97   : > { %v578_v31 = vsel %vm576_vm4, %v573_v25, %v575_v29 }
  0x98   : > { %981 = vmatmul.mubr.msk.bf16.vlgmr.msra.gmra.mrb[0].mxu1 %vm277_vm2, %v979_v28  ;;  %994 = vmatprep.subr.msk.bf16.mxu0 %vm281_vm1, %v578_v31  ;;  %v634_v33 = vpop.permute.xlu1 %633 }
  0x99   : > { %589 = vmatpush1.bf16.msra.mxu0 %v583_v32  ;;  %339 = vmatpush1.bf16.msra.mxu1 %v333_v30 }
  0x9a   : > { %v636_v35 = vpop.permute.xlu0 %635  ;;  %370 = vmatprep.mubr.bf16.mxu1 %v1067_v6 }
  0x9b   : > { %v640_v36 = vsel %vm639_vm5, %v634_v33, %v636_v35 }
  0x9c   : > { %995 = vmatmul.mubr.msk.bf16.vlgmr.msra.gmra.mrb[0].mxu0 %vm277_vm2, %v993_v34  ;;  %v646_v37 = vsel %vm281_vm1, %v640_v36, 0  ;;  %v638_v38 = vpop.permute.xlu1 %637 }
  0x9d   : > { %v641_v39 = vsel %vm639_vm5, %v636_v35, %v638_v38  ;;  %683 = vmatprep.mubr.bf16.mxu0 %v1067_v6 }
  0x9e   : > { %997 = vmatprep.subr.msk.bf16.mxu0 %vm281_vm1, %v641_v39  ;;  %v382_v40 = vpop.permute.xlu0 %381 }
  0x9f   : > { %652 = vmatpush1.bf16.msra.mxu0 %v646_v37 }
  0xa0   : > { %v384_v41 = vpop.permute.xlu1 %383 }
  0xa1   : > { %v388_v42 = vsel %vm387_vm6, %v382_v40, %v384_v41 }
  0xa2   : > { %v394_v44 = vsel %vm281_vm1, %v388_v42, 0  ;;  %v386_v45 = vpop.permute.xlu0 %385 }
  0xa3   : > { %v389_v46 = vsel %vm387_vm6, %v384_v41, %v386_v45 }
  0xa4   : > { %983 = vmatmul.mubr.msk.bf16.vlgmr.msra.gmra.mrb[0].mxu1 %vm277_vm2, %v248_v43  ;;  %v697_v47 = vpop.permute.xlu1 %696  ;;  %985 = vmatprep.subr.msk.bf16.mxu1 %vm281_vm1, %v389_v46 }
  0xa5   : > { %400 = vmatpush1.bf16.msra.mxu1 %v394_v44  ;;  %431 = vmatprep.mubr.bf16.mxu1 %v1067_v6 }
  0xa6   : > { %v699_v49 = vpop.permute.xlu0 %698 }
  0xa7   : > { %v703_v50 = vsel %vm702_vm7, %v697_v47, %v699_v49 }
  0xa8   : > { %998 = vmatmul.mubr.msk.bf16.vlgmr.msra.gmra.mrb[0].mxu0 %vm277_vm2, %v996_v48  ;;  %v709_v51 = vsel %vm281_vm1, %v703_v50, 0  ;;  %v701_v52 = vpop.permute.xlu1 %700 }
  0xa9   : > { %v704_v53 = vsel %vm702_vm7, %v699_v49, %v701_v52  ;;  %746 = vmatprep.mubr.bf16.mxu0 %v1067_v6 }
  0xaa   : > { %1000 = vmatprep.subr.msk.bf16.mxu0 %vm281_vm1, %v704_v53  ;;  %v445_v54 = vpop.permute.xlu0 %444 }
  0xab   : > { %715 = vmatpush1.bf16.msra.mxu0 %v709_v51 }
  0xac   : > { %v447_v55 = vpop.permute.xlu1 %446 }
  0xad   : > { %v451_v56 = vsel %vm450_vm8, %v445_v54, %v447_v55 }
  0xae   : > { %v457_v58 = vsel %vm281_vm1, %v451_v56, 0  ;;  %v449_v59 = vpop.permute.xlu0 %448 }
  0xaf   : > { %v452_v60 = vsel %vm450_vm8, %v447_v55, %v449_v59 }
  0xb0   : > { %986 = vmatmul.mubr.msk.bf16.vlgmr.msra.gmra.mrb[0].mxu1 %vm277_vm2, %v984_v57  ;;  %v760_v61 = vpop.permute.xlu1 %759  ;;  %988 = vmatprep.subr.msk.bf16.mxu1 %vm281_vm1, %v452_v60 }
  0xb1   : > { %463 = vmatpush1.bf16.msra.mxu1 %v457_v58  ;;  %494 = vmatprep.mubr.bf16.mxu1 %v1067_v6 }
  0xb2   : > { %v762_v63 = vpop.permute.xlu0 %761 }
  0xb3   : > { %v766_v0 = vsel %vm765_vm9, %v760_v61, %v762_v63 }
  0xb4   : > { %1001 = vmatmul.mubr.msk.bf16.vlgmr.msra.gmra.mrb[0].mxu0 %vm277_vm2, %v999_v62  ;;  %v772_v1 = vsel %vm281_vm1, %v766_v0, 0  ;;  %v764_v2 = vpop.permute.xlu1 %763 }
  0xb5   : > { %v767_v4 = vsel %vm765_vm9, %v762_v63, %v764_v2  ;;  %809 = vmatprep.mubr.bf16.mxu0 %v1067_v6  ;;  %v822_v6 = vld [vmem:[%s1220_s2] sm:$0x3] }
  0xb6   : > { %1003 = vmatprep.subr.msk.bf16.mxu0 %vm281_vm1, %v767_v4  ;;  %v827_v14 = vrot.slane %v822_v6, %v826_v8  ;;  %v831_v16 = vrot.slane %v822_v6, %v830_v10 }
  0xb7   : > { %778 = vmatpush1.bf16.msra.mxu0 %v772_v1 }
  0xbc   : > { %989 = vmatmul.mubr.msk.bf16.vlgmr.msra.gmra.mrb[0].mxu1 %vm277_vm2, %v987_v5 }
  0xc0   : > { %1004 = vmatmul.mubr.msk.bf16.vlgmr.msra.gmra.mrb[0].mxu0 %vm277_vm2, %v1002_v7 }
 0x18f   : > { %v496_v9 = vpop.f32.mrb[0].mxu1 }
 0x190   : > { %v498_v11 = vpop.f32.mrb[1].mxu1 }
 0x191   : > { %v500_v12 = vpop.f32.mrb[2].mxu1 }
 0x192   : > { %v501_v13 = vpop.f32.mrb[3].mxu1 }
 0x193   : > { %v811_v15 = vpop.f32.mrb[0].mxu0 }
 0x194   : > { %v1008_v17 = vadd.f32 %v811_v15, %v496_v9  ;;  %v813_v18 = vpop.f32.mrb[1].mxu0 }
 0x195   : > { %v1009_v19 = vadd.f32 %v813_v18, %v498_v11  ;;  %v815_v20 = vpop.f32.mrb[2].mxu0 }
 0x196   : > { %820 = vst [vmem:[%s237_s7] sm:$0xff] %v1008_v17  ;;  %v816_v21 = vpop.f32.mrb[3].mxu0  ;;  %v834_v22 = vmul.f32 %v1008_v17, %v827_v14 }
 0x197   : > { %821 = vst [vmem:[%s237_s7 + $0x8] sm:$0xff] %v1009_v19  ;;  %v835_v3 = vmul.f32 %v1009_v19, %v831_v16 }
 0x199   : > { %v836_v23 = vadd.f32 %v835_v3, %v834_v22 }
 0x19b   : > { %837 = vadd.xlane.f32.xlu0 %v836_v23 }
 0x228   : > { %v838_v24 = vpop.xlane.xlu0 %837 }
 0x229   : > { %840 = vst.msk [vmem:[%s241_s11] sm:$0xff] %vm839_vm10, %v838_v24  ;;  %v841_v25 = vmul.f32 0.0051020407, %v838_v24 }
 0x22b   : > { %v842_v26 = vsub.f32 %v1008_v17, %v841_v25  ;;  %v843_v27 = vsub.f32 %v1009_v19, %v841_v25 }
 0x22d   : > { %v844_v28 = vmul.f32 %v842_v26, %v827_v14  ;;  %v845_v29 = vmul.f32 %v843_v27, %v831_v16 }
 0x22f   : > { %v846_v30 = vmul.f32 %v844_v28, %v844_v28  ;;  %v847_v31 = vmul.f32 %v845_v29, %v845_v29 }
 0x231   : > { %v848_v32 = vadd.f32 %v847_v31, %v846_v30 }
 0x233   : > { %849 = vadd.xlane.f32.xlu1 %v848_v32 }
 0x2c0   : > { %v850_v33 = vpop.xlane.xlu1 %849 }
 0x2c1   : > { %851 = vst.msk [vmem:[%s245_s19] sm:$0xff] %vm839_vm10, %v850_v33 }
 0x2c2 PF: > { %s16_s18 = sadd.s32 1, %s1064_s18  }
 0x2c3   : > { %p13_p4 = scmp.ge.s32.totalorder %s16_s18, 4  }
 0x2c5   :  { %15 = sbr.rel (!%p13_p4) target bundleno = 1 (0x1), region = 94 }

</bundles_post_ra>
